<compile_context>
chip_gen: v6e
topology: v6e:2x2x1
jax: 0.10.0
libtpu: 0.0.40
codegen_flags: <defaults>
</compile_context>

<pallas_src>
import functools

import jax
import jax.numpy as jnp
from jax import lax
from jax.experimental import pallas as pl
from jax.experimental.pallas import tpu as pltpu


def _round_up(x: int, m: int) -> int:
    return (x + m - 1) // m * m


def _vmem_capacity_bytes() -> int:
    """Physical VMEM per TensorCore; conservative (v7x, 64 MiB) if query fails."""
    try:
        return int(pltpu.get_tpu_info().vmem_capacity_bytes)
    except Exception:
        return 64 * 1024 * 1024


def _clip_loss_kernel(li_ref, lt_ref, out_ref, *, n_rows: int, use_diag_window: bool):
    """One row tile: out <- splat( sum_valid_rows(lse - diag) over BOTH matrices )."""
    tm = li_ref.shape[0]
    row_base = pl.program_id(0) * tm

    # Global row index per local row, kept 2-D [TM, 1] (sublane-major).
    local_row = lax.broadcasted_iota(jnp.int32, (tm, 1), 0)            # [TM, 1]
    global_row = local_row + row_base                                  # [TM, 1]
    valid = global_row < n_rows                                        # [TM, 1] bool

    if use_diag_window:
        # Diagonal of rows [row_base, row_base+tm) lives in the 128-aligned,
        # in-bounds column window [row_base, row_base+tm): slice just that window
        # and use a static local-diagonal mask (TM-wide instead of C-wide VALU).
        col_start = pl.multiple_of(row_base, 128)
        eq_local = lax.broadcasted_iota(jnp.int32, (tm, tm), 1) == local_row
        eq_i = eq_t = None
    else:
        # Fallback: full-width lane-iota mask; the compare is computed once and
        # shared between the two matrices when their widths match.
        c_i, c_t = li_ref.shape[-1], lt_ref.shape[-1]
        eq_i = lax.broadcasted_iota(jnp.int32, (tm, c_i), 1) == global_row
        eq_t = eq_i if c_t == c_i else (
            lax.broadcasted_iota(jnp.int32, (tm, c_t), 1) == global_row)

    def ce_partial(ref, eq_full):
        x = ref[...].astype(jnp.float32)                               # per-tile upcast only
        m = jnp.max(x, axis=-1, keepdims=True)                         # [TM, 1]
        lse = m + jnp.log(jnp.sum(jnp.exp(x - m), axis=-1, keepdims=True))
        if eq_full is None:
            w = ref[:, pl.ds(col_start, tm)].astype(jnp.float32)       # [TM, TM] window
            diag = jnp.sum(jnp.where(eq_local, w, 0.0), axis=-1, keepdims=True)
        else:
            diag = jnp.sum(jnp.where(eq_full, x, 0.0), axis=-1, keepdims=True)
        # Select (not multiply) so garbage rows of the ragged last tile (which
        # may be +/-Inf or NaN) can never poison the partial sum.
        return jnp.sum(jnp.where(valid, lse - diag, 0.0))

    total = ce_partial(li_ref, eq_i) + ce_partial(lt_ref, eq_t)
    # Lane-dense (1, 8, 128) splat -> full-vreg, unmasked vector store.
    out_ref[...] = jnp.broadcast_to(total, out_ref.shape)


def clip_loss(logits_per_image: jax.Array, logits_per_text: jax.Array) -> jax.Array:
    """Pallas TPU implementation of ClipLoss.forward. Returns a scalar f32."""
    assert logits_per_image.ndim == 2 and logits_per_text.ndim == 2
    n, c_i = logits_per_image.shape
    n_t, c_t = logits_per_text.shape
    assert n_t == n, "both logits must share the batch dimension"
    assert n >= 1
    # PyTorch semantics: labels = arange(n) must be valid class indices.
    assert n <= c_i and n <= c_t

    isize_i = jnp.dtype(logits_per_image.dtype).itemsize
    isize_t = jnp.dtype(logits_per_text.dtype).itemsize
    # Native sublane packing: 8 rows (f32), 16 (bf16/f16), 32 (int8/fp8).
    row_pack = max(8, 32 // min(isize_i, isize_t))

    # --- Generation-aware VMEM budget & row-tile selection --------------------
    vmem_cap = _vmem_capacity_bytes()
    if vmem_cap >= 128 * 1024 * 1024:          # v5e / v6e
        vmem_limit = 96 * 1024 * 1024
        tm = 1024
    else:                                      # v7x (64 MiB per TensorCore)
        vmem_limit = 48 * 1024 * 1024
        tm = 512
    budget = (vmem_limit * 3) // 4             # headroom for outputs / misc scratch

    def tile_footprint(tm_: int) -> int:
        # Double-buffered input slabs + per-tile f32 upcast/exp working set.
        slabs = 2 * tm_ * (c_i * isize_i + c_t * isize_t)
        f32_tmp = 2 * tm_ * max(c_i, c_t) * 4
        return slabs + f32_tmp

    while tm > row_pack and tile_footprint(tm) > budget:
        tm //= 2
    # TODO(synk): for rows so wide that even TM=row_pack overflows VMEM, add a
    # column-tile grid axis with an online (streaming) logsumexp reduction.

    tm = min(tm, _round_up(n, row_pack))
    # Prefer >= 2 grid steps so both v7x TensorCores get work; keep the split
    # 128-aligned for larger n so the diagonal-window path stays eligible.
    half = -(-n // 2)
    if n > 128:
        tm = min(tm, _round_up(half, 128))
    elif half >= row_pack:
        tm = min(tm, _round_up(half, row_pack))
    if tm > n:
        tm = n  # full-extent single block (always a legal block shape)

    num_tiles = pl.cdiv(n, tm)
    n_span = num_tiles * tm
    # Window path needs an always-128-aligned start and no reach past either C.
    use_diag_window = (tm % 128 == 0) and (n_span <= c_i) and (n_span <= c_t)

    def run(window: bool):
        return pl.pallas_call(
            functools.partial(_clip_loss_kernel, n_rows=n, use_diag_window=window),
            out_shape=jax.ShapeDtypeStruct((num_tiles, 8, 128), jnp.float32),
            grid_spec=pltpu.PrefetchScalarGridSpec(
                num_scalar_prefetch=0,
                grid=(num_tiles,),
                in_specs=[
                    pl.BlockSpec((tm, c_i), lambda i: (i, 0)),
                    pl.BlockSpec((tm, c_t), lambda i: (i, 0)),
                ],
                out_specs=pl.BlockSpec((1, 8, 128), lambda i: (i, 0, 0)),
            ),
            compiler_params=pltpu.CompilerParams(
                dimension_semantics=("parallel",),
                vmem_limit_bytes=vmem_limit,
            ),
        )(logits_per_image, logits_per_text)

    if use_diag_window:
        try:
            partials = run(True)
        except Exception:
            # The 128-aligned dynamic lane-window slice lowers on current Mosaic
            # toolchains; if a toolchain rejects it (eager mode only), fall back
            # to the full-width mask path instead of failing.
            partials = run(False)
    else:
        partials = run(False)

    # Tiny final reduction outside the kernel: loss = (sum_i + sum_t) / (2 * n).
    return jnp.sum(partials[:, 0, 0]) / (2.0 * n)


def _clip_loss_ref(logits_per_image, logits_per_text):
    """Pure-JAX reference for correctness checking."""
    def ce(logits):
        logits = logits.astype(jnp.float32)
        m = logits.shape[0]
        logp = jax.nn.log_softmax(logits, axis=-1)
        return -jnp.mean(logp[jnp.arange(m), jnp.arange(m)])
    return (ce(logits_per_image) + ce(logits_per_text)) / 2.0


if __name__ == "__main__":
    key = jax.random.PRNGKey(0)
    k1, k2, k3, k4, k5, k6 = jax.random.split(key, 6)

    # 1) Small square CLIP batch (typical use of the module): single tile.
    n = 8
    li = jax.random.normal(k1, (n, n), dtype=jnp.float32) * 3.0
    lt = li.T + 0.1 * jax.random.normal(k2, (n, n), dtype=jnp.float32)
    loss = clip_loss(li, lt)
    jax.block_until_ready(loss)
    ref = _clip_loss_ref(li, lt)
    assert jnp.allclose(loss, ref, atol=1e-4, rtol=1e-5), (loss, ref)

    # 2) Non-aligned square batch: multi-tile grid, ragged last tile masked
    #    in-kernel (no host padding), full-width diag fallback path.
    n2 = 300
    li2 = jax.random.normal(k3, (n2, n2), dtype=jnp.float32) * 3.0
    lt2 = li2.T + 0.1 * jax.random.normal(k4, (n2, n2), dtype=jnp.float32)
    loss2 = clip_loss(li2, lt2)
    jax.block_until_ready(loss2)
    ref2 = _clip_loss_ref(li2, lt2)
    assert jnp.allclose(loss2, ref2, atol=1e-4, rtol=1e-5), (loss2, ref2)

    # 3) Wide-class bf16 case: exercises the 128-aligned diagonal-window path,
    #    the bf16 sublane pack (TM multiple of 16) and the >=2-tile split.
    n3, c3 = 256, 1024
    li3 = (jax.random.normal(k5, (n3, c3), dtype=jnp.float32) * 3.0).astype(jnp.bfloat16)
    lt3 = (jax.random.normal(k6, (n3, c3), dtype=jnp.float32) * 3.0).astype(jnp.bfloat16)
    loss3 = clip_loss(li3, lt3)
    jax.block_until_ready(loss3)
    ref3 = _clip_loss_ref(li3, lt3)
    assert jnp.allclose(loss3, ref3, atol=2e-3, rtol=1e-4), (loss3, ref3)

    print("KERNEL_OK")
</pallas_src>

<mosaic_0001>
module attributes {stable_mosaic.version = 11 : i64} {
  func.func @_clip_loss_kernel(%arg0: i32, %arg1: memref<8x8xf32, #tpu.memory_space<vmem>>, %arg2: memref<8x8xf32, #tpu.memory_space<vmem>>, %arg3: memref<1x8x128xf32, #tpu.memory_space<vmem>>) attributes {dimension_semantics = [#tpu.dimension_semantics<parallel>], iteration_bounds = array<i64: 1>, scalar_prefetch = 0 : i64, scratch_operands = 0 : i64, tpu.core_type = #tpu.core_type<tc>, window_params = [{transform_indices = @transform_0, window_bounds = array<i64: 8, 8>}, {transform_indices = @transform_1, window_bounds = array<i64: 8, 8>}, {transform_indices = @transform_2, window_bounds = array<i64: 1, 8, 128>}]} {
    %c8_i32 = arith.constant 8 : i32
    %0 = arith.muli %arg0, %c8_i32 : i32
    %1 = tpu.iota {dimensions = array<i32: 0>} : vector<8x1xi32>
    %2 = vector.broadcast %0 : i32 to vector<8x1xi32>
    %3 = arith.addi %1, %2 : vector<8x1xi32>
    %c8_i32_0 = arith.constant 8 : i32
    %4 = vector.broadcast %c8_i32_0 : i32 to vector<8x1xi32>
    %5 = arith.cmpi slt, %3, %4 : vector<8x1xi32>
    %6 = tpu.iota {dimensions = array<i32: 1>} : vector<8x8xi32>
    %7 = vector.broadcast %3 : vector<8x1xi32> to vector<8x8xi32>
    %8 = arith.cmpi eq, %6, %7 : vector<8x8xi32>
    %c0 = arith.constant 0 : index
    %c0_1 = arith.constant 0 : index
    %9 = vector.load %arg1[%c0, %c0_1] : memref<8x8xf32, #tpu.memory_space<vmem>>, vector<8x8xf32>
    %cst = arith.constant dense<0xFF800000> : vector<8xf32>
    %10 = vector.multi_reduction <maximumf>, %9, %cst [1] : vector<8x8xf32> to vector<8xf32>
    %11 = vector.shape_cast %10 : vector<8xf32> to vector<8x1xf32>
    %12 = vector.broadcast %11 : vector<8x1xf32> to vector<8x8xf32>
    %13 = arith.subf %9, %12 : vector<8x8xf32>
    %14 = math.exp %13 : vector<8x8xf32>
    %cst_2 = arith.constant dense<0.000000e+00> : vector<8xf32>
    %15 = vector.multi_reduction <add>, %14, %cst_2 [1] : vector<8x8xf32> to vector<8xf32>
    %16 = vector.shape_cast %15 : vector<8xf32> to vector<8x1xf32>
    %17 = math.log %16 : vector<8x1xf32>
    %18 = arith.addf %11, %17 : vector<8x1xf32>
    %cst_3 = arith.constant 0.000000e+00 : f32
    %19 = vector.broadcast %cst_3 : f32 to vector<8x8xf32>
    %20 = arith.select %8, %9, %19 : vector<8x8xi1>, vector<8x8xf32>
    %cst_4 = arith.constant dense<0.000000e+00> : vector<8xf32>
    %21 = vector.multi_reduction <add>, %20, %cst_4 [1] : vector<8x8xf32> to vector<8xf32>
    %22 = vector.shape_cast %21 : vector<8xf32> to vector<8x1xf32>
    %23 = arith.subf %18, %22 : vector<8x1xf32>
    %cst_5 = arith.constant 0.000000e+00 : f32
    %24 = vector.broadcast %cst_5 : f32 to vector<8x1xf32>
    %25 = arith.select %5, %23, %24 : vector<8x1xi1>, vector<8x1xf32>
    %26 = vector.shape_cast %25 : vector<8x1xf32> to vector<1x8x1xf32>
    %cst_6 = arith.constant dense<0.000000e+00> : vector<1xf32>
    %27 = vector.multi_reduction <add>, %26, %cst_6 [1, 2] : vector<1x8x1xf32> to vector<1xf32>
    %28 = vector.shape_cast %27 : vector<1xf32> to vector<1x1x1xf32>
    %29 = vector.extract %28[0, 0, 0] : f32 from vector<1x1x1xf32>
    %c0_7 = arith.constant 0 : index
    %c0_8 = arith.constant 0 : index
    %30 = vector.load %arg2[%c0_7, %c0_8] : memref<8x8xf32, #tpu.memory_space<vmem>>, vector<8x8xf32>
    %cst_9 = arith.constant dense<0xFF800000> : vector<8xf32>
    %31 = vector.multi_reduction <maximumf>, %30, %cst_9 [1] : vector<8x8xf32> to vector<8xf32>
    %32 = vector.shape_cast %31 : vector<8xf32> to vector<8x1xf32>
    %33 = vector.broadcast %32 : vector<8x1xf32> to vector<8x8xf32>
    %34 = arith.subf %30, %33 : vector<8x8xf32>
    %35 = math.exp %34 : vector<8x8xf32>
    %cst_10 = arith.constant dense<0.000000e+00> : vector<8xf32>
    %36 = vector.multi_reduction <add>, %35, %cst_10 [1] : vector<8x8xf32> to vector<8xf32>
    %37 = vector.shape_cast %36 : vector<8xf32> to vector<8x1xf32>
    %38 = math.log %37 : vector<8x1xf32>
    %39 = arith.addf %32, %38 : vector<8x1xf32>
    %cst_11 = arith.constant 0.000000e+00 : f32
    %40 = vector.broadcast %cst_11 : f32 to vector<8x8xf32>
    %41 = arith.select %8, %30, %40 : vector<8x8xi1>, vector<8x8xf32>
    %cst_12 = arith.constant dense<0.000000e+00> : vector<8xf32>
    %42 = vector.multi_reduction <add>, %41, %cst_12 [1] : vector<8x8xf32> to vector<8xf32>
    %43 = vector.shape_cast %42 : vector<8xf32> to vector<8x1xf32>
    %44 = arith.subf %39, %43 : vector<8x1xf32>
    %cst_13 = arith.constant 0.000000e+00 : f32
    %45 = vector.broadcast %cst_13 : f32 to vector<8x1xf32>
    %46 = arith.select %5, %44, %45 : vector<8x1xi1>, vector<8x1xf32>
    %47 = vector.shape_cast %46 : vector<8x1xf32> to vector<1x8x1xf32>
    %cst_14 = arith.constant dense<0.000000e+00> : vector<1xf32>
    %48 = vector.multi_reduction <add>, %47, %cst_14 [1, 2] : vector<1x8x1xf32> to vector<1xf32>
    %49 = vector.shape_cast %48 : vector<1xf32> to vector<1x1x1xf32>
    %50 = vector.extract %49[0, 0, 0] : f32 from vector<1x1x1xf32>
    %51 = arith.addf %29, %50 : f32
    %52 = vector.broadcast %51 : f32 to vector<1x8x128xf32>
    %c0_15 = arith.constant 0 : index
    %c0_16 = arith.constant 0 : index
    %c0_17 = arith.constant 0 : index
    %53 = vector.load %arg3[%c0_15, %c0_16, %c0_17] : memref<1x8x128xf32, #tpu.memory_space<vmem>>, vector<1x8x128xf32>
    tpu.vector_store %arg3[%c0_15, %c0_16, %c0_17], %52 {strides = array<i32>} : memref<1x8x128xf32, #tpu.memory_space<vmem>>, vector<1x8x128xf32>,
    return
  }
  func.func @transform_0(%arg0: i32) -> (i32, i32) {
    %c0_i32 = arith.constant 0 : i32
    %c0_i32_0 = arith.constant 0 : i32
    return %arg0, %c0_i32 : i32, i32
  }
  func.func @transform_1(%arg0: i32) -> (i32, i32) {
    %c0_i32 = arith.constant 0 : i32
    %c0_i32_0 = arith.constant 0 : i32
    return %arg0, %c0_i32 : i32, i32
  }
  func.func @transform_2(%arg0: i32) -> (i32, i32, i32) {
    %c0_i32 = arith.constant 0 : i32
    %c0_i32_0 = arith.constant 0 : i32
    %c0_i32_1 = arith.constant 0 : i32
    return %arg0, %c0_i32, %c0_i32_0 : i32, i32, i32
  }
}

</mosaic_0001>

<bundles_post_ra>
// kernel: tpu_custom_call.1
= control target key start
LH: loop header
LB: loop body
LE: loop exit
PB: predicated region body
PF: predicated region fallthrough
CT: control target
= control target key end

     0   :  { %7 = vsyncpa [#allocation3], 0  ;;  %s240_s0 = inlined_call_operand.hbm [shape: f32[8,8], index: 0, kind: input, shape index: {}]   ;;  %s241_s1 = inlined_call_operand.hbm [shape: f32[8,8], index: 1, kind: input, shape index: {}]   ;;  %s242_s2 = inlined_call_operand.hbm [shape: f32[1,8,128], index: 2, kind: output, shape index: {}]  }
   0x1   :  { %8 = vsyncpa [#allocation6], 0 }
   0x2   :  { %9 = vsyncpa [#allocation4], 0  ;;  %s205_s9 = smov [#allocation2]   ;;  %s206_s11 = smov [#allocation5]  }
   0x3   :  { %s16_s10 = sshll.u32 %s205_s9, 4  ;;  %s26_s12 = sshll.u32 %s206_s11, 4  ;;  %s17_s10 = int_to_ptr.vmem [resolvable:$true] %s16_s10  ;;  %s27_s12 = int_to_ptr.vmem [resolvable:$true] %s26_s12 }
   0x4   :  { %s147_s13 = scalar_lea.vmem %s17_s10, 128  ;;  %p152_p1 = scmp.lt.s32.totalorder %s17_s10, %s17_s10 }
   0x5   :  { %p148_p0 = scmp.ne.s32.totalorder %s17_s10, %s147_s13  ;;  %p153_p2 = scmp.lt.s32.totalorder %s147_s13, %s147_s13 }
   0x7   :  { %p154_p3 = por %p153_p2, %p152_p1 }
   0x9   :  { %p155_p4 = pnand %p154_p3, %p148_p0 }
   0xb   :  { %158 = shalt.err (!%p155_p4)
}
   0xc   :  { %19 = dma.hbm_to_vmem [thread:$0]  %s240_s0, 128, %s17_s10, [#allocation3]  }
   0xd   :  { %s167_s16 = scalar_lea.vmem %s27_s12, 128  ;;  %p172_p6 = scmp.lt.s32.totalorder %s27_s12, %s27_s12 }
   0xe   :  { %p168_p5 = scmp.ne.s32.totalorder %s27_s12, %s167_s16  ;;  %p173_p7 = scmp.lt.s32.totalorder %s167_s16, %s167_s16 }
  0x10   :  { %p174_p8 = por %p173_p7, %p172_p6 }
  0x12   :  { %p175_p9 = pnand %p174_p8, %p168_p5 }
  0x14   :  { %178 = shalt.err (!%p175_p9)
}
  0x15   :  { %29 = dma.hbm_to_vmem [thread:$0]  %s241_s1, 128, %s27_s12, [#allocation6]  }
  0x16   :  { %199 = dma.done.wait [#allocation3], 128  }
  0x17   :  { %200 = vsyncadd [#allocation3], 4294967168 }
  0x18   :  { %201 = dma.done.wait [#allocation6], 128  }
  0x19   :  { %202 = vsyncadd [#allocation6], 4294967168  ;;  %vm46_vm0 = vcmask 64512   ;;  %v45_v0 = vld [vmem:[#allocation2] sm:$0xff]  ;;  %v76_v1 = vld [vmem:[#allocation5] sm:$0xff]  ;;  %v37_v4 = vlaneseq  ;;  %vm65_vm2 = vcmask 7168  }
  0x1a   :  { %v47_v2 = vsel %vm46_vm0, %v45_v0, -inf  ;;  %v77_v3 = vsel %vm46_vm0, %v76_v1, -inf  ;;  %s207_s1 = smov [#allocation7]  }
  0x1b   :  { %48 = vmax.xlane.f32.xlu0 %v47_v2  ;;  %v38_v5 = vshrl.u32 %v37_v4, 7  ;;  %v43_v6 = vand.u32 127, %v37_v4  ;;  %s114_s19 = sshll.u32 %s207_s1, 4  ;;  %s115_s19 = int_to_ptr.vmem [resolvable:$true] %s114_s19 }
  0x1c   :  { %s179_s22 = scalar_lea.vmem %s115_s19, 128  ;;  %p184_p11 = scmp.lt.s32.totalorder %s115_s19, %s115_s19 }
  0x1d   :  { %vm44_vm1 = vcmp.eq.s32.totalorder %v43_v6, %v38_v5  ;;  %p180_p10 = scmp.ne.s32.totalorder %s115_s19, %s179_s22  ;;  %p185_p12 = scmp.lt.s32.totalorder %s179_s22, %s179_s22 }
  0x1e   :  { %v59_v7 = vsel %vm44_vm1, %v45_v0, 0.0  ;;  %v89_v18 = vsel %vm44_vm1, %v76_v1, 0.0 }
  0x1f   :  { %78 = vmax.xlane.f32.xlu0 %v77_v3  ;;  %v60_v8 = vsel %vm46_vm0, %v59_v7, 0.0  ;;  %v90_v20 = vsel %vm46_vm0, %v89_v18, 0.0  ;;  %p186_p13 = por %p185_p12, %p184_p11 }
  0x21   :  { %p187_p0 = pnand %p186_p13, %p180_p10 }
  0x23   :  { %61 = vadd.xlane.f32.xlu0 %v60_v8 }
  0xa4   :  { %v49_v9 = vpop.xlane.xlu0 %48 }
  0xa5   :  { %v50_v10 = vsub.f32 %v45_v0, %v49_v9 }
  0xa7   :  { %v51_v11 = vmul.f32 1.442695, %v50_v10 }
  0xa8   :  { %v79_v12 = vpop.xlane.xlu0 %78 }
  0xa9   :  { %131 = vpow2.f32 %v51_v11  ;;  %v80_v13 = vsub.f32 %v76_v1, %v79_v12 }
  0xab   :  { %v81_v14 = vmul.f32 1.442695, %v80_v13 }
  0xac   :  { %v62_v25 = vpop.xlane.xlu0 %61 }
  0xad   :  { %133 = vpow2.f32 %v81_v14 }
  0xb6   :  { %v132_v15 = vpop.eup %131 }
  0xb7   :  { %v53_v16 = vsel %vm46_vm0, %v132_v15, 0.0 }
  0xb8   :  { %54 = vadd.xlane.f32.xlu1 %v53_v16 }
  0xba   :  { %v134_v17 = vpop.eup %133 }
  0xbb   :  { %v83_v19 = vsel %vm46_vm0, %v134_v17, 0.0 }
  0xbc   :  { %84 = vadd.xlane.f32.xlu1 %v83_v19 }
  0xc0   :  { %91 = vadd.xlane.f32.xlu1 %v90_v20 }
 0x141   :  { %v55_v21 = vpop.xlane.xlu1 %54 }
 0x142   :  { %135 = vlog2.f32 %v55_v21 }
 0x145   :  { %v85_v22 = vpop.xlane.xlu1 %84 }
 0x146   :  { %137 = vlog2.f32 %v85_v22 }
 0x149   :  { %v92_v30 = vpop.xlane.xlu1 %91 }
 0x14f   :  { %v136_v23 = vpop.eup %135 }
 0x150   :  { %v57_v24 = vmul.f32 0.6931472, %v136_v23 }
 0x152   :  { %v58_v26 = vadd.f32 %v57_v24, %v49_v9 }
 0x153   :  { %v138_v27 = vpop.eup %137 }
 0x154   :  { %v87_v28 = vmul.f32 0.6931472, %v138_v27  ;;  %v63_v29 = vsub.f32 %v58_v26, %v62_v25 }
 0x156   :  { %v88_v31 = vadd.f32 %v87_v28, %v79_v12  ;;  %v66_v32 = vsel %vm65_vm2, %v63_v29, 0.0 }
 0x157   :  { %67 = vadd.xlane.f32.xlu0 %v66_v32 }
 0x158   :  { %v93_v33 = vsub.f32 %v88_v31, %v92_v30 }
 0x15a   :  { %v95_v34 = vsel %vm65_vm2, %v93_v33, 0.0 }
 0x15b   :  { %96 = vadd.xlane.f32.xlu1 %v95_v34 }
 0x1e0   :  { %v68_v35 = vpop.xlane.xlu0 %67 }
 0x1e1   :  { %v69_v36 = vrot.slane %v68_v35, 4 }
 0x1e3   :  { %v70_v37 = vadd.f32 %v69_v36, %v68_v35 }
 0x1e4   :  { %v97_v38 = vpop.xlane.xlu1 %96 }
 0x1e5   :  { %v71_v39 = vrot.slane %v70_v37, 2  ;;  %v98_v40 = vrot.slane %v97_v38, 4 }
 0x1e7   :  { %v99_v41 = vadd.f32 %v98_v40, %v97_v38  ;;  %v72_v42 = vadd.f32 %v71_v39, %v70_v37 }
 0x1e9   :  { %v100_v43 = vrot.slane %v99_v41, 2  ;;  %v73_v44 = vrot.slane %v72_v42, 1 }
 0x1eb   :  { %v101_v45 = vadd.f32 %v100_v43, %v99_v41  ;;  %v74_v46 = vadd.f32 %v73_v44, %v72_v42 }
 0x1ed   :  { %124 = vpush %v74_v46  ;;  %v102_v47 = vrot.slane %v101_v45, 1 }
 0x1ef   :  { %v103_v48 = vadd.f32 %v102_v47, %v101_v45 }
 0x1f1   :  { %126 = vpush %v103_v48 }
 0x21e   :  { %s125_s0 = spop %124 }
 0x222   :  { %s127_s20 = spop %126 }
 0x223   :  { %s105_s21 = sadd.f32 %s127_s20, %s125_s0 }
 0x225   :  { %v106_v49 = vstv %s105_s21 }
 0x226   :  { %107 = vst [vmem:[#allocation7] sm:$0xff] %v106_v49 }
 0x227   :  { %190 = shalt.err (!%p187_p0)
}
 0x228   :  { %117 = dma.vmem_to_hbm [thread:$0]  %s115_s19, 128, %s242_s2, [#allocation4]  }
 0x229   :  { %203 = dma.done.wait [#allocation4], 128  }
 0x22a   :  { %204 = vsyncadd [#allocation4], 4294967168 }
 0x22b   :  { %121 = vsyncpa [#allocation3], 1 }
 0x22c   :  { %122 = vsyncpa [#allocation6], 1 }
 0x22d   :  { %123 = vsyncpa [#allocation4], 1 }

</bundles_post_ra>
